<compile_context>
chip_gen: v5e
topology: v5e:2x2
jax: 0.10.0
libtpu: 0.0.40
codegen_flags: <defaults>
</compile_context>

<pallas_src>
import functools

import jax
import jax.numpy as jnp
from jax import lax
from jax.experimental import pallas as pl
from jax.experimental.pallas import tpu as pltpu

LANES = 128
MAX_BLOCK_ROWS = 2048  # 2048*128*4B = 1 MiB per f32 input block; 2 in x 2 buf = 4 MiB


def _focal_block(pred_ref, tgt_ref, *, gamma, alpha, n, block_rows):
    """Elementwise focal loss for the current (block_rows, LANES) block.

    Out-of-range elements (padding / Pallas edge-block fill) are forced to
    benign values before the logs and zeroed in the result.
    """
    i = pl.program_id(0)
    p = pred_ref[...].astype(jnp.float32)
    t = tgt_ref[...].astype(jnp.float32)

    row_ids = lax.broadcasted_iota(jnp.int32, (block_rows, LANES), 0)
    col_ids = lax.broadcasted_iota(jnp.int32, (block_rows, LANES), 1)
    flat_idx = (i * block_rows + row_ids) * LANES + col_ids
    valid = flat_idx < n

    p = jnp.where(valid, p, 0.5)  # keep log(p), log(1-p) finite on invalid lanes
    t = jnp.where(valid, t, 0.0)

    log_p = jnp.log(p)
    log_1mp = jnp.log(1.0 - p)

    if gamma == 2.0:
        pow_1mp = (1.0 - p) * (1.0 - p)
        pow_p = p * p
    elif gamma == 1.0:
        pow_1mp = 1.0 - p
        pow_p = p
    elif gamma == 0.0:
        pow_1mp = jnp.ones_like(p)
        pow_p = jnp.ones_like(p)
    else:
        # x**gamma == exp(gamma * log x); reuse the logs already computed
        pow_1mp = jnp.exp(gamma * log_1mp)
        pow_p = jnp.exp(gamma * log_p)

    loss_pos = -t * pow_1mp * log_p
    loss_neg = -(1.0 - t) * pow_p * log_1mp
    if 0.0 <= alpha <= 1.0:
        loss_pos = loss_pos * alpha
        loss_neg = loss_neg * (1.0 - alpha)
    loss = loss_pos + loss_neg
    return jnp.where(valid, loss, 0.0)


def _focal_partial_sum_kernel(pred_ref, tgt_ref, out_ref, *, gamma, alpha, n,
                              block_rows):
    loss = _focal_block(pred_ref, tgt_ref, gamma=gamma, alpha=alpha, n=n,
                        block_rows=block_rows)
    # per-block, per-lane partial sums; cross-lane reduce done in the wrapper
    out_ref[...] = jnp.sum(loss, axis=0, keepdims=True)


def _focal_elementwise_kernel(pred_ref, tgt_ref, out_ref, *, gamma, alpha, n,
                              block_rows):
    out_ref[...] = _focal_block(pred_ref, tgt_ref, gamma=gamma, alpha=alpha,
                                n=n, block_rows=block_rows)


def binary_focal_loss_pallas(pred, target, gamma=2.0, alpha=-1,
                             reduction="mean"):
    """Pallas implementation of binary_focal_loss forward (mean/sum/none)."""
    assert pred.shape == target.shape
    n = pred.size
    gamma = float(gamma)
    alpha = float(alpha)

    flat_p = jnp.ravel(pred)
    flat_t = jnp.ravel(target)
    rem = (-n) % LANES
    if rem:  # tiny pad only when n is not lane-aligned; values masked in-kernel
        flat_p = jnp.pad(flat_p, (0, rem))
        flat_t = jnp.pad(flat_t, (0, rem))
    rows = (n + rem) // LANES
    p2 = flat_p.reshape(rows, LANES)
    t2 = flat_t.reshape(rows, LANES)

    block_rows = rows if rows <= MAX_BLOCK_ROWS else MAX_BLOCK_ROWS
    num_blocks = pl.cdiv(rows, block_rows)

    in_specs = [
        pl.BlockSpec((block_rows, LANES), lambda i: (i, 0)),
        pl.BlockSpec((block_rows, LANES), lambda i: (i, 0)),
    ]
    compiler_params = pltpu.CompilerParams(
        dimension_semantics=("parallel",))  # independent blocks -> both TCs on v7x

    if reduction in ("mean", "sum"):
        kernel = functools.partial(_focal_partial_sum_kernel, gamma=gamma,
                                   alpha=alpha, n=n, block_rows=block_rows)
        partials = pl.pallas_call(
            kernel,
            out_shape=jax.ShapeDtypeStruct((num_blocks, LANES), jnp.float32),
            grid=(num_blocks,),
            in_specs=in_specs,
            out_specs=pl.BlockSpec((1, LANES), lambda i: (i, 0)),
            compiler_params=compiler_params,
        )(p2, t2)
        total = jnp.sum(partials)
        if reduction == "mean":
            return total / jnp.float32(n)
        return total
    elif reduction == "none":
        kernel = functools.partial(_focal_elementwise_kernel, gamma=gamma,
                                   alpha=alpha, n=n, block_rows=block_rows)
        loss2d = pl.pallas_call(
            kernel,
            out_shape=jax.ShapeDtypeStruct((rows, LANES), jnp.float32),
            grid=(num_blocks,),
            in_specs=in_specs,
            out_specs=pl.BlockSpec((block_rows, LANES), lambda i: (i, 0)),
            compiler_params=compiler_params,
        )(p2, t2)
        # output is f32 regardless of input dtype (matches f32 reference math)
        return jnp.ravel(loss2d)[:n].reshape(pred.shape)
    else:
        raise RuntimeError("unsupported reduction: %s" % reduction)


class BinaryFocalLoss:
    def __init__(self, gamma=2.0, alpha=-1):
        self.gamma, self.alpha = gamma, alpha

    def __call__(self, pred, target, reduction="mean"):
        return binary_focal_loss_pallas(pred, target, self.gamma, self.alpha,
                                        reduction)


def _reference(pred, target, gamma=2.0, alpha=-1, reduction="mean"):
    pred = pred.astype(jnp.float32)
    target = target.astype(jnp.float32)
    loss_pos = -target * (1.0 - pred) ** gamma * jnp.log(pred)
    loss_neg = -(1.0 - target) * pred ** gamma * jnp.log(1.0 - pred)
    if 0.0 <= alpha <= 1.0:
        loss_pos = loss_pos * alpha
        loss_neg = loss_neg * (1.0 - alpha)
    loss = loss_pos + loss_neg
    if reduction == "mean":
        return jnp.mean(loss)
    if reduction == "sum":
        return jnp.sum(loss)
    return loss


if __name__ == "__main__":
    key = jax.random.PRNGKey(0)
    k1, k2 = jax.random.split(key)

    # NCHW-like inputs: batch=2, channels=4, spatial=16x16
    shape = (2, 4, 16, 16)
    eps = 1e-4
    pred = jax.random.uniform(k1, shape, jnp.float32, minval=eps, maxval=1.0 - eps)
    target = jax.random.bernoulli(k2, 0.3, shape).astype(jnp.float32)

    loss_fn = BinaryFocalLoss(gamma=2.0, alpha=-1)

    out_mean = jax.block_until_ready(loss_fn(pred, target, reduction="mean"))
    ref_mean = _reference(pred, target, 2.0, -1, "mean")
    assert jnp.allclose(out_mean, ref_mean, rtol=1e-5, atol=1e-6), (out_mean, ref_mean)

    out_sum = jax.block_until_ready(loss_fn(pred, target, reduction="sum"))
    ref_sum = _reference(pred, target, 2.0, -1, "sum")
    assert jnp.allclose(out_sum, ref_sum, rtol=1e-5, atol=1e-5), (out_sum, ref_sum)

    # general-gamma + alpha-weighted path
    out_a = jax.block_until_ready(
        binary_focal_loss_pallas(pred, target, gamma=1.5, alpha=0.25,
                                 reduction="mean"))
    ref_a = _reference(pred, target, 1.5, 0.25, "mean")
    assert jnp.allclose(out_a, ref_a, rtol=1e-5, atol=1e-6), (out_a, ref_a)

    # elementwise ('none') path
    out_none = jax.block_until_ready(loss_fn(pred, target, reduction="none"))
    ref_none = _reference(pred, target, 2.0, -1, "none")
    assert out_none.shape == shape
    assert jnp.allclose(out_none, ref_none, rtol=1e-5, atol=1e-6)

    print("KERNEL_OK")
</pallas_src>

<mosaic_0001>
module attributes {stable_mosaic.version = 11 : i64} {
  func.func @_focal_partial_sum_kernel(%arg0: i32, %arg1: memref<16x128xf32, #tpu.memory_space<vmem>>, %arg2: memref<16x128xf32, #tpu.memory_space<vmem>>, %arg3: memref<1x128xf32, #tpu.memory_space<vmem>>) attributes {dimension_semantics = [#tpu.dimension_semantics<parallel>], iteration_bounds = array<i64: 1>, scalar_prefetch = 0 : i64, scratch_operands = 0 : i64, tpu.core_type = #tpu.core_type<tc>, window_params = [{transform_indices = @transform_0, window_bounds = array<i64: 16, 128>}, {transform_indices = @transform_1, window_bounds = array<i64: 16, 128>}, {transform_indices = @transform_2, window_bounds = array<i64: 1, 128>}]} {
    %c0 = arith.constant 0 : index
    %c0_0 = arith.constant 0 : index
    %0 = vector.load %arg1[%c0, %c0_0] : memref<16x128xf32, #tpu.memory_space<vmem>>, vector<16x128xf32>
    %c0_1 = arith.constant 0 : index
    %c0_2 = arith.constant 0 : index
    %1 = vector.load %arg2[%c0_1, %c0_2] : memref<16x128xf32, #tpu.memory_space<vmem>>, vector<16x128xf32>
    %2 = tpu.iota {dimensions = array<i32: 0>} : vector<16x128xi32>
    %3 = tpu.iota {dimensions = array<i32: 1>} : vector<16x128xi32>
    %c16_i32 = arith.constant 16 : i32
    %4 = arith.muli %arg0, %c16_i32 : i32
    %5 = vector.broadcast %4 : i32 to vector<16x128xi32>
    %6 = arith.addi %5, %2 : vector<16x128xi32>
    %c128_i32 = arith.constant 128 : i32
    %7 = vector.broadcast %c128_i32 : i32 to vector<16x128xi32>
    %8 = arith.muli %6, %7 : vector<16x128xi32>
    %9 = arith.addi %8, %3 : vector<16x128xi32>
    %c2048_i32 = arith.constant 2048 : i32
    %10 = vector.broadcast %c2048_i32 : i32 to vector<16x128xi32>
    %11 = arith.cmpi slt, %9, %10 : vector<16x128xi32>
    %cst = arith.constant 5.000000e-01 : f32
    %12 = vector.broadcast %cst : f32 to vector<16x128xf32>
    %13 = arith.select %11, %0, %12 : vector<16x128xi1>, vector<16x128xf32>
    %cst_3 = arith.constant 0.000000e+00 : f32
    %14 = vector.broadcast %cst_3 : f32 to vector<16x128xf32>
    %15 = arith.select %11, %1, %14 : vector<16x128xi1>, vector<16x128xf32>
    %16 = math.log %13 : vector<16x128xf32>
    %cst_4 = arith.constant 1.000000e+00 : f32
    %17 = vector.broadcast %cst_4 : f32 to vector<16x128xf32>
    %18 = arith.subf %17, %13 : vector<16x128xf32>
    %19 = math.log %18 : vector<16x128xf32>
    %cst_5 = arith.constant 1.000000e+00 : f32
    %20 = vector.broadcast %cst_5 : f32 to vector<16x128xf32>
    %21 = arith.subf %20, %13 : vector<16x128xf32>
    %cst_6 = arith.constant 1.000000e+00 : f32
    %22 = vector.broadcast %cst_6 : f32 to vector<16x128xf32>
    %23 = arith.subf %22, %13 : vector<16x128xf32>
    %24 = arith.mulf %21, %23 : vector<16x128xf32>
    %25 = arith.mulf %13, %13 : vector<16x128xf32>
    %cst_7 = arith.constant 0.000000e+00 : f32
    %26 = vector.broadcast %cst_7 : f32 to vector<16x128xf32>
    %27 = arith.subf %26, %15 : vector<16x128xf32>
    %28 = arith.mulf %27, %24 : vector<16x128xf32>
    %29 = arith.mulf %28, %16 : vector<16x128xf32>
    %cst_8 = arith.constant 1.000000e+00 : f32
    %30 = vector.broadcast %cst_8 : f32 to vector<16x128xf32>
    %31 = arith.subf %30, %15 : vector<16x128xf32>
    %cst_9 = arith.constant 0.000000e+00 : f32
    %32 = vector.broadcast %cst_9 : f32 to vector<16x128xf32>
    %33 = arith.subf %32, %31 : vector<16x128xf32>
    %34 = arith.mulf %33, %25 : vector<16x128xf32>
    %35 = arith.mulf %34, %19 : vector<16x128xf32>
    %36 = arith.addf %29, %35 : vector<16x128xf32>
    %cst_10 = arith.constant 0.000000e+00 : f32
    %37 = vector.broadcast %cst_10 : f32 to vector<16x128xf32>
    %38 = arith.select %11, %36, %37 : vector<16x128xi1>, vector<16x128xf32>
    %cst_11 = arith.constant dense<0.000000e+00> : vector<128xf32>
    %39 = vector.multi_reduction <add>, %38, %cst_11 [0] : vector<16x128xf32> to vector<128xf32>
    %40 = vector.shape_cast %39 : vector<128xf32> to vector<1x128xf32>
    %c0_12 = arith.constant 0 : index
    %c0_13 = arith.constant 0 : index
    %41 = vector.load %arg3[%c0_12, %c0_13] : memref<1x128xf32, #tpu.memory_space<vmem>>, vector<1x128xf32>
    tpu.vector_store %arg3[%c0_12, %c0_13], %40 {strides = array<i32>} : memref<1x128xf32, #tpu.memory_space<vmem>>, vector<1x128xf32>,
    return
  }
  func.func @transform_0(%arg0: i32) -> (i32, i32) {
    %c0_i32 = arith.constant 0 : i32
    %c0_i32_0 = arith.constant 0 : i32
    return %arg0, %c0_i32 : i32, i32
  }
  func.func @transform_1(%arg0: i32) -> (i32, i32) {
    %c0_i32 = arith.constant 0 : i32
    %c0_i32_0 = arith.constant 0 : i32
    return %arg0, %c0_i32 : i32, i32
  }
  func.func @transform_2(%arg0: i32) -> (i32, i32) {
    %c0_i32 = arith.constant 0 : i32
    %c0_i32_0 = arith.constant 0 : i32
    return %arg0, %c0_i32 : i32, i32
  }
}

</mosaic_0001>

<bundles_post_ra>
// kernel: tpu_custom_call.1
= control target key start
LH: loop header
LB: loop body
LE: loop exit
PB: predicated region body
PF: predicated region fallthrough
CT: control target
= control target key end

     0   :  { %7 = vsyncpa [#allocation3], 0  ;;  %s251_s0 = inlined_call_operand.hbm [shape: f32[16,128], index: 0, kind: input, shape index: {}]   ;;  %s252_s1 = inlined_call_operand.hbm [shape: f32[16,128], index: 1, kind: input, shape index: {}]   ;;  %s253_s2 = inlined_call_operand.hbm [shape: f32[1,128], index: 2, kind: output, shape index: {}]  }
   0x1   :  { %8 = vsyncpa [#allocation6], 0 }
   0x2   :  { %9 = vsyncpa [#allocation4], 0  ;;  %s14_s11 = sshll.u32 %s251_s0, 4  ;;  %s216_s12 = smov [#allocation2]   ;;  %s15_s11 = int_to_ptr.hbm [resolvable:$true] %s14_s11 }
   0x3   :  { %s16_s13 = sshll.u32 %s216_s12, 4  ;;  %s27_s16 = sshll.u32 %s252_s1, 4  ;;  %s17_s13 = int_to_ptr.vmem [resolvable:$true] %s16_s13  ;;  %s28_s16 = int_to_ptr.hbm [resolvable:$true] %s27_s16 }
   0x4   :  { %s217_s17 = smov 128   ;;  %s218_s18 = smov 8  }
   0x5   :  { %22 = dma.hbm_to_vmem [thread:$0]  %s15_s11, 256, %s17_s13, [#allocation3], %s217_s17, %s217_s17, %s218_s18  }
   0x6   :  { %s219_s19 = smov [#allocation5]  }
   0x7   :  { %s29_s20 = sshll.u32 %s219_s19, 4  ;;  %s30_s20 = int_to_ptr.vmem [resolvable:$true] %s29_s20 }
   0x8   :  { %35 = dma.hbm_to_vmem [thread:$0]  %s28_s16, 256, %s30_s20, [#allocation6], %s217_s17, %s217_s17, %s218_s18  }
   0x9   :  { %210 = dma.done.wait [#allocation3], 256  }
   0xa   :  { %211 = vsyncadd [#allocation3], 4294967040 }
   0xb   :  { %212 = dma.done.wait [#allocation6], 256  }
   0xc   :  { %213 = vsyncadd [#allocation6], 4294967040  ;;  %v48_v0 = vlaneseq  ;;  %v44_v7 = vld [vmem:[#allocation2] sm:$0xff]  ;;  %v46_v8 = vld [vmem:[#allocation5] sm:$0xff]  ;;  %s220_s0 = smov [#allocation7]   ;;  %s114_s23 = sshll.u32 %s253_s2, 4  ;;  %s115_s23 = int_to_ptr.hbm [resolvable:$true] %s114_s23 }
   0xd   :  { %v45_v9 = vld [vmem:[#allocation2 + $0x8] sm:$0xff]  ;;  %v47_v10 = vld [vmem:[#allocation5 + $0x8] sm:$0xff]  ;;  %s112_s1 = sshll.u32 %s220_s0, 4  ;;  %s113_s1 = int_to_ptr.vmem [resolvable:$true] %s112_s1 }
   0xe   :  { %v49_v1 = vshrl.u32 %v48_v0, 7  ;;  %v52_v2 = vand.u32 127, %v48_v0 }
  0x10   :  { %v50_v3 = vadd.s32 8, %v49_v1  ;;  %v57_v4 = vmul.u32 128, %v49_v1 }
  0x12   :  { %v58_v5 = vmul.u32 128, %v50_v3  ;;  %v59_v6 = vadd.s32 %v57_v4, %v52_v2 }
  0x14   :  { %v60_v11 = vadd.s32 %v58_v5, %v52_v2  ;;  %vm61_vm0 = vcmp.lt.s32.totalorder %v59_v6, 2048 }
  0x15   :  { %v63_v12 = vsel %vm61_vm0, %v44_v7, 0.5  ;;  %v65_v13 = vsel %vm61_vm0, %v46_v8, 0.0 }
  0x16   :  { %vm62_vm1 = vcmp.lt.s32.totalorder %v60_v11, 2048  ;;  %130 = vlog2.f32 %v63_v12  ;;  %v71_v14 = vsub.f32 1.0, %v63_v12  ;;  %v87_v17 = vsub.f32 1.0, %v65_v13 }
  0x17   :  { %v64_v15 = vsel %vm62_vm1, %v45_v9, 0.5  ;;  %v66_v16 = vsel %vm62_vm1, %v47_v10, 0.0  ;;  %v81_v20 = vsub.f32 0.0, %v65_v13  ;;  %v79_v24 = vmul.f32 %v63_v12, %v63_v12 }
  0x18   :  { %132 = vlog2.f32 %v64_v15  ;;  %v72_v18 = vsub.f32 1.0, %v64_v15  ;;  %v77_v19 = vmul.f32 %v71_v14, %v71_v14  ;;  %v82_v21 = vsub.f32 0.0, %v66_v16 }
  0x19   :  { %134 = vlog2.f32 %v71_v14  ;;  %v88_v22 = vsub.f32 1.0, %v66_v16  ;;  %v89_v25 = vsub.f32 0.0, %v87_v17  ;;  %v80_v26 = vmul.f32 %v64_v15, %v64_v15 }
  0x1a   :  { %136 = vlog2.f32 %v72_v18  ;;  %v78_v23 = vmul.f32 %v72_v18, %v72_v18  ;;  %v83_v29 = vmul.f32 %v81_v20, %v77_v19 }
  0x1b   :  { %v90_v27 = vsub.f32 0.0, %v88_v22  ;;  %v91_v33 = vmul.f32 %v89_v25, %v79_v24 }
  0x1c   :  { %v131_v28 = vpop.eup %130  ;;  %v84_v31 = vmul.f32 %v82_v21, %v78_v23 }
  0x1d   :  { %v68_v30 = vmul.f32 0.6931472, %v131_v28  ;;  %v92_v36 = vmul.f32 %v90_v27, %v80_v26 }
  0x1e   :  { %v133_v32 = vpop.eup %132 }
  0x1f   :  { %v135_v34 = vpop.eup %134  ;;  %v70_v35 = vmul.f32 0.6931472, %v133_v32  ;;  %v85_v39 = vmul.f32 %v83_v29, %v68_v30 }
  0x20   :  { %v137_v37 = vpop.eup %136  ;;  %v74_v38 = vmul.f32 0.6931472, %v135_v34 }
  0x21   :  { %v76_v40 = vmul.f32 0.6931472, %v137_v37  ;;  %v86_v41 = vmul.f32 %v84_v31, %v70_v35 }
  0x22   :  { %v93_v42 = vmul.f32 %v91_v33, %v74_v38 }
  0x23   :  { %v94_v43 = vmul.f32 %v92_v36, %v76_v40 }
  0x24   :  { %v95_v44 = vadd.f32 %v93_v42, %v85_v39 }
  0x25   :  { %v96_v45 = vadd.f32 %v94_v43, %v86_v41 }
  0x26   :  { %v97_v46 = vsel %vm61_vm0, %v95_v44, 0.0 }
  0x27   :  { %v98_v47 = vsel %vm62_vm1, %v96_v45, 0.0 }
  0x28   :  { %v99_v48 = vadd.f32 %v98_v47, %v97_v46 }
  0x2a   :  { %v100_v49 = vrot.slane %v99_v48, 4 }
  0x2c   :  { %v101_v50 = vadd.f32 %v100_v49, %v99_v48 }
  0x2e   :  { %v102_v51 = vrot.slane %v101_v50, 2 }
  0x30   :  { %v103_v52 = vadd.f32 %v102_v51, %v101_v50 }
  0x32   :  { %v104_v53 = vrot.slane %v103_v52, 1 }
  0x34   :  { %v105_v54 = vadd.f32 %v104_v53, %v103_v52 }
  0x36   :  { %106 = vst [vmem:[#allocation7] sm:$0x1] %v105_v54 }
  0x37   :  { %117 = dma.vmem_to_hbm [thread:$0]  %s113_s1, 16, %s115_s23, [#allocation4]  }
  0x38   :  { %214 = dma.done.wait [#allocation4], 16  }
  0x39   :  { %215 = vsyncadd [#allocation4], 4294967280 }
  0x3a   :  { %122 = vsyncpa [#allocation3], 1 }
  0x3b   :  { %123 = vsyncpa [#allocation6], 1 }
  0x3c   :  { %124 = vsyncpa [#allocation4], 1 }

</bundles_post_ra>
